<compile_context>
chip_gen: v7x
topology: tpu7x:2x2x1
jax: 0.10.0
libtpu: 0.0.40
codegen_flags: <defaults>
</compile_context>

<pallas_src>
import jax
import jax.numpy as jnp
from jax.experimental import pallas as pl
from jax.experimental.pallas import tpu as pltpu


# ---------------------------------------------------------------------------
# Kernels
# ---------------------------------------------------------------------------
def _folded_layer_kernel(scal_ref, h_out_ref, h_src_ref, a_t_ref, o_ref, acc_ref):
    """One folded PhiPsiGNN layer, tiled: grid = (out-col tile j, reduce tile k).

    out_row[0, i] = wx*h[i] + b + sum_j A[i, j] * (c*h[j] + d)
                  = wx*h[i] + b + ((c*h + d) @ A^T)[0, i]

    scal_ref (SMEM, (4,)) = [c, d, wx, b].
    """
    k = pl.program_id(1)

    @pl.when(k == 0)
    def _():
        acc_ref[...] = jnp.zeros_like(acc_ref)

    # Folded message vector for this reduction tile (source nodes).
    v = (scal_ref[0] * h_src_ref[...] + scal_ref[1]).astype(a_t_ref.dtype)  # (1, TK)
    # Aggregation == lane-dense matvec on the MXU: (1, TK) @ (TK, TN).
    acc_ref[...] += jnp.dot(v, a_t_ref[...], preferred_element_type=jnp.float32)

    @pl.when(k == pl.num_programs(1) - 1)
    def _():
        # phi "self" term + bias, written once per output tile (unmasked vst).
        o_ref[...] = (scal_ref[2] * h_out_ref[...] + scal_ref[3]
                      + acc_ref[...]).astype(o_ref.dtype)


def _pool_kernel(out_ref, s_ref, y_ref, acc_ref):
    """Per-graph sum pooling: y[0, b] = sum_i S[i, b] * out[0, i], tiled over node tiles."""
    k = pl.program_id(0)

    @pl.when(k == 0)
    def _():
        acc_ref[...] = jnp.zeros_like(acc_ref)

    acc_ref[...] += jnp.dot(out_ref[...], s_ref[...],
                            preferred_element_type=jnp.float32)

    @pl.when(k == pl.num_programs(0) - 1)
    def _():
        y_ref[...] = acc_ref[...]


# ---------------------------------------------------------------------------
# Wrappers
# ---------------------------------------------------------------------------
def _round_up(n, m):
    return ((n + m - 1) // m) * m


def _pick_tile(n_rounded_128, itemsize):
    # Largest tile whose double-buffered A^T block stays far inside the 32 MiB
    # scoped-VMEM budget on every generation (v7x has only 64 MiB physical).
    # 512 f32 (1 MiB/block) or 1024 bf16 (2 MiB/block) x 2 buffers << 32 MiB.
    cap = 1024 if itemsize <= 2 else 512
    return min(cap, n_rounded_128)


_VMEM_LIMIT = 32 * 1024 * 1024  # explicit, safe on v5e/v6e/v7x


def _folded_layer(h_row, a_t, scalars, tile):
    """h_row: (1, Np) f32, a_t: (Np, Np), scalars: (4,) f32 -> (1, Np) f32."""
    n_pad = h_row.shape[1]
    grid = (n_pad // tile, n_pad // tile)
    return pl.pallas_call(
        _folded_layer_kernel,
        out_shape=jax.ShapeDtypeStruct((1, n_pad), jnp.float32),
        grid_spec=pltpu.PrefetchScalarGridSpec(
            num_scalar_prefetch=0,
            grid=grid,
            in_specs=[
                pl.BlockSpec(memory_space=pltpu.MemorySpace.SMEM),   # 4 folded scalars
                pl.BlockSpec((1, tile), lambda j, k: (0, j)),        # h at output cols
                pl.BlockSpec((1, tile), lambda j, k: (0, k)),        # h at source cols
                pl.BlockSpec((tile, tile), lambda j, k: (k, j)),     # A^T tile (src, tgt)
            ],
            out_specs=pl.BlockSpec((1, tile), lambda j, k: (0, j)),
            scratch_shapes=[pltpu.VMEM((1, tile), jnp.float32)],
        ),
        compiler_params=pltpu.CompilerParams(
            dimension_semantics=("parallel", "arbitrary"),
            vmem_limit_bytes=_VMEM_LIMIT,
        ),
    )(scalars, h_row, h_row, a_t)


def _pool(out_row, s_onehot, tile):
    """out_row: (1, Np) f32, s_onehot: (Np, Bp) f32 -> (1, Bp) f32."""
    n_pad = out_row.shape[1]
    b_pad = s_onehot.shape[1]
    return pl.pallas_call(
        _pool_kernel,
        out_shape=jax.ShapeDtypeStruct((1, b_pad), jnp.float32),
        grid_spec=pltpu.PrefetchScalarGridSpec(
            num_scalar_prefetch=0,
            grid=(n_pad // tile,),
            in_specs=[
                pl.BlockSpec((1, tile), lambda k: (0, k)),
                pl.BlockSpec((tile, b_pad), lambda k: (k, 0)),
            ],
            out_specs=pl.BlockSpec((1, b_pad), lambda k: (0, 0)),
            scratch_shapes=[pltpu.VMEM((1, b_pad), jnp.float32)],
        ),
        compiler_params=pltpu.CompilerParams(
            dimension_semantics=("arbitrary",),
            vmem_limit_bytes=_VMEM_LIMIT,
        ),
    )(out_row, s_onehot)


def two_message_passing_gnn(x, edge_index, batch, num_graphs, params,
                            *, matmul_dtype=jnp.float32):
    """x: (N, 1) f32, edge_index: (2, E) int32, batch: (N,) int32.

    Returns (out_nodes (N,), y_graphs (num_graphs, 1)) matching the PyTorch forward.
    """
    N = x.shape[0]

    Wpsi1, bpsi1 = params["psi1"]    # (mes1, 1), (mes1,)
    Wphi1, bphi1 = params["phi1"]    # (1, 1+mes1), (1,)
    Wpsi2, bpsi2 = params["psi2"]    # (mes2, 1), (mes2,)
    Wphi2, bphi2 = params["phi2"]    # (1, 1+mes2), (1,)
    # The fold requires d_in == d_out == 1 per layer (module's view(-1,1) forces hid1=1).
    assert Wpsi1.shape[1] == 1 and Wphi1.shape[0] == 1
    assert Wpsi2.shape[1] == 1 and Wphi2.shape[0] == 1

    # Fold the linear psi into the linear phi:  sum_k Wphi_m[k]*agg[:,k]
    #   == A @ (c*h + d)  with  c = <Wphi_m, Wpsi[:,0]>,  d = <Wphi_m, bpsi>.
    s1 = jnp.stack([Wphi1[0, 1:] @ Wpsi1[:, 0], Wphi1[0, 1:] @ bpsi1,
                    Wphi1[0, 0], bphi1[0]]).astype(jnp.float32)
    s2 = jnp.stack([Wphi2[0, 1:] @ Wpsi2[:, 0], Wphi2[0, 1:] @ bpsi2,
                    Wphi2[0, 0], bphi2[0]]).astype(jnp.float32)

    itemsize = jnp.dtype(matmul_dtype).itemsize
    n128 = _round_up(N, 128)
    tile = _pick_tile(n128, itemsize)
    n_pad = _round_up(N, tile)
    b_pad = _round_up(num_graphs, 128)

    # Glue (data-dependent scatter into dense operators, done once in XLA).
    # A^T[src, tgt] counts edges src->tgt; padded rows/cols are zero so padded
    # nodes contribute nothing.
    # TODO(synk): for large sparse graphs replace the dense A^T with a CSR /
    # scalar-prefetch (PrefetchScalarGridSpec) segment-sum kernel.
    src, tgt = edge_index[0], edge_index[1]
    a_t = jnp.zeros((n_pad, n_pad), jnp.float32).at[src, tgt].add(1.0)
    a_t = a_t.astype(matmul_dtype)

    h0 = jnp.zeros((1, n_pad), jnp.float32).at[0, :N].set(
        x.reshape(-1).astype(jnp.float32))
    s_onehot = jnp.zeros((n_pad, b_pad), jnp.float32).at[
        jnp.arange(N), batch].set(1.0)

    h1 = _folded_layer(h0, a_t, s1, tile)        # layer 1 -> (1, Np)
    out = _folded_layer(h1, a_t, s2, tile)       # layer 2 -> (1, Np)
    y = _pool(out, s_onehot, tile)               # pooling -> (1, Bp)

    # Match PyTorch forward: x.flatten() -> (N,),  y -> (num_graphs, 1)
    return out[0, :N], y[0, :num_graphs].reshape(num_graphs, 1)


# ---------------------------------------------------------------------------
# Pure-JAX scatter-based reference mirroring the PyTorch/PyG semantics.
# ---------------------------------------------------------------------------
def _reference(x, edge_index, batch, num_graphs, params):
    src, tgt = edge_index[0], edge_index[1]

    def phipsi(h, psi, phi):
        W_psi, b_psi = psi
        W_phi, b_phi = phi
        msg = h[src] @ W_psi.T + b_psi                       # psi(x_j) per edge
        agg = jnp.zeros((h.shape[0], W_psi.shape[0]), jnp.float32).at[tgt].add(msg)
        out = jnp.concatenate([h, agg], axis=1) @ W_phi.T + b_phi
        return out.reshape(-1)                               # flatten()

    h = phipsi(x, params["psi1"], params["phi1"]).reshape(-1, 1)
    o = phipsi(h, params["psi2"], params["phi2"]).reshape(-1, 1)
    y = jnp.zeros((num_graphs, 1), jnp.float32).at[batch].add(o)
    return o.reshape(-1), y


def _init_linear(key, d_out, d_in):
    # PyTorch nn.Linear default: U(-1/sqrt(fan_in), 1/sqrt(fan_in))
    kw, kb = jax.random.split(key)
    bound = 1.0 / jnp.sqrt(jnp.float32(d_in))
    W = jax.random.uniform(kw, (d_out, d_in), jnp.float32, -bound, bound)
    b = jax.random.uniform(kb, (d_out,), jnp.float32, -bound, bound)
    return W, b


if __name__ == "__main__":
    key = jax.random.PRNGKey(0)

    # Small deterministic graph batch: 2 graphs of 8 nodes each (bidirected rings).
    N, B = 16, 2
    mes1, hid1, mes2 = 4, 1, 4   # hid1 must be 1 (module's view(-1, 1) between layers)

    batch = jnp.concatenate([jnp.zeros(8, jnp.int32), jnp.ones(8, jnp.int32)])
    edges = []
    for g in range(B):
        base = g * 8
        for i in range(8):
            edges.append((base + i, base + (i + 1) % 8))
            edges.append((base + (i + 1) % 8, base + i))
    edge_index = jnp.array(edges, dtype=jnp.int32).T          # (2, 32)

    key, kx, k1, k2, k3, k4 = jax.random.split(key, 6)
    x = jax.random.normal(kx, (N, 1), jnp.float32)            # graph.x, d_in = 1

    params = {
        "psi1": _init_linear(k1, mes1, 1),
        "phi1": _init_linear(k2, hid1, 1 + mes1),
        "psi2": _init_linear(k3, mes2, hid1),
        "phi2": _init_linear(k4, 1, hid1 + mes2),
    }

    x_ref, y_ref = _reference(x, edge_index, batch, B, params)

    # f32 path: exact (to fp rounding) match against the scatter reference.
    x_out, y_out = two_message_passing_gnn(x, edge_index, batch, B, params,
                                           matmul_dtype=jnp.float32)
    jax.block_until_ready((x_out, y_out))
    assert x_out.shape == (N,) and y_out.shape == (B, 1)
    assert jnp.allclose(x_out, x_ref, rtol=1e-5, atol=1e-5)
    assert jnp.allclose(y_out, y_ref, rtol=1e-5, atol=1e-5)

    # bf16-adjacency path (v6e/v7x HBM-traffic optimization): edge counts are
    # exact in bf16, only the folded message vector is rounded, so tolerance
    # is relaxed as flagged in the perf review.
    x_bf, y_bf = two_message_passing_gnn(x, edge_index, batch, B, params,
                                         matmul_dtype=jnp.bfloat16)
    jax.block_until_ready((x_bf, y_bf))

    def _loose_close(a, b, frac=0.1):
        return bool(jnp.max(jnp.abs(a - b)) <= frac * (1.0 + jnp.max(jnp.abs(b))))

    assert _loose_close(x_bf, x_ref)
    assert _loose_close(y_bf, y_ref)

    print("KERNEL_OK")
</pallas_src>

<mosaic_0001>
module attributes {stable_mosaic.version = 11 : i64} {
  func.func @_folded_layer_kernel(%arg0: i32, %arg1: i32, %arg2: memref<4xf32, #tpu.memory_space<smem>>, %arg3: memref<1x128xf32, #tpu.memory_space<vmem>>, %arg4: memref<1x128xf32, #tpu.memory_space<vmem>>, %arg5: memref<128x128xf32, #tpu.memory_space<vmem>>, %arg6: memref<1x128xf32, #tpu.memory_space<vmem>>, %arg7: memref<1x128xf32, #tpu.memory_space<vmem>>) attributes {dimension_semantics = [#tpu.dimension_semantics<parallel>, #tpu.dimension_semantics<arbitrary>], iteration_bounds = array<i64: 1, 1>, scalar_prefetch = 0 : i64, scratch_operands = 1 : i64, tpu.core_type = #tpu.core_type<tc>, window_params = [{transform_indices = @transform_0, window_bounds = array<i64: 4>}, {transform_indices = @transform_1, window_bounds = array<i64: 1, 128>}, {transform_indices = @transform_2, window_bounds = array<i64: 1, 128>}, {transform_indices = @transform_3, window_bounds = array<i64: 128, 128>}, {transform_indices = @transform_4, window_bounds = array<i64: 1, 128>}]} {
    %c0_i32 = arith.constant 0 : i32
    %0 = arith.cmpi eq, %arg1, %c0_i32 : i32
    %1 = arith.extui %0 : i1 to i32
    %c0_i32_0 = arith.constant 0 : i32
    %2 = arith.cmpi ne, %1, %c0_i32_0 : i32
    scf.if %2 {
      %cst_11 = arith.constant 0.000000e+00 : f32
      %18 = vector.broadcast %cst_11 : f32 to vector<1x128xf32>
      %c0_12 = arith.constant 0 : index
      %c0_13 = arith.constant 0 : index
      %19 = vector.load %arg7[%c0_12, %c0_13] : memref<1x128xf32, #tpu.memory_space<vmem>>, vector<1x128xf32>
      tpu.vector_store %arg7[%c0_12, %c0_13], %18 {strides = array<i32>} : memref<1x128xf32, #tpu.memory_space<vmem>>, vector<1x128xf32>,
    } else {
    }
    %c0 = arith.constant 0 : index
    %3 = memref.load %arg2[%c0] : memref<4xf32, #tpu.memory_space<smem>>
    %c0_1 = arith.constant 0 : index
    %c0_2 = arith.constant 0 : index
    %4 = vector.load %arg4[%c0_1, %c0_2] : memref<1x128xf32, #tpu.memory_space<vmem>>, vector<1x128xf32>
    %5 = vector.broadcast %3 : f32 to vector<1x128xf32>
    %6 = arith.mulf %5, %4 : vector<1x128xf32>
    %c1 = arith.constant 1 : index
    %7 = memref.load %arg2[%c1] : memref<4xf32, #tpu.memory_space<smem>>
    %8 = vector.broadcast %7 : f32 to vector<1x128xf32>
    %9 = arith.addf %6, %8 : vector<1x128xf32>
    %c0_3 = arith.constant 0 : index
    %c0_4 = arith.constant 0 : index
    %10 = vector.load %arg7[%c0_3, %c0_4] : memref<1x128xf32, #tpu.memory_space<vmem>>, vector<1x128xf32>
    %c0_5 = arith.constant 0 : index
    %c0_6 = arith.constant 0 : index
    %11 = vector.load %arg5[%c0_5, %c0_6] : memref<128x128xf32, #tpu.memory_space<vmem>>, vector<128x128xf32>
    %cst = arith.constant dense<0.000000e+00> : vector<1x128xf32>
    %12 = tpu.matmul %9, %11, %cst {dimension_numbers = #tpu.dot_dimension_numbers<[1], [0], [0], [1], [0, 0, 1, 1], [], []>} : vector<1x128xf32>, vector<128x128xf32>, vector<1x128xf32> -> vector<1x128xf32>
    %13 = arith.addf %10, %12 : vector<1x128xf32>
    %c0_7 = arith.constant 0 : index
    %c0_8 = arith.constant 0 : index
    %14 = vector.load %arg7[%c0_7, %c0_8] : memref<1x128xf32, #tpu.memory_space<vmem>>, vector<1x128xf32>
    tpu.vector_store %arg7[%c0_7, %c0_8], %13 {strides = array<i32>} : memref<1x128xf32, #tpu.memory_space<vmem>>, vector<1x128xf32>,
    %c0_i32_9 = arith.constant 0 : i32
    %15 = arith.cmpi eq, %arg1, %c0_i32_9 : i32
    %16 = arith.extui %15 : i1 to i32
    %c0_i32_10 = arith.constant 0 : i32
    %17 = arith.cmpi ne, %16, %c0_i32_10 : i32
    scf.if %17 {
      %c2 = arith.constant 2 : index
      %18 = memref.load %arg2[%c2] : memref<4xf32, #tpu.memory_space<smem>>
      %c0_11 = arith.constant 0 : index
      %c0_12 = arith.constant 0 : index
      %19 = vector.load %arg3[%c0_11, %c0_12] : memref<1x128xf32, #tpu.memory_space<vmem>>, vector<1x128xf32>
      %20 = vector.broadcast %18 : f32 to vector<1x128xf32>
      %21 = arith.mulf %20, %19 : vector<1x128xf32>
      %c3 = arith.constant 3 : index
      %22 = memref.load %arg2[%c3] : memref<4xf32, #tpu.memory_space<smem>>
      %23 = vector.broadcast %22 : f32 to vector<1x128xf32>
      %24 = arith.addf %21, %23 : vector<1x128xf32>
      %c0_13 = arith.constant 0 : index
      %c0_14 = arith.constant 0 : index
      %25 = vector.load %arg7[%c0_13, %c0_14] : memref<1x128xf32, #tpu.memory_space<vmem>>, vector<1x128xf32>
      %26 = arith.addf %24, %25 : vector<1x128xf32>
      %c0_15 = arith.constant 0 : index
      %c0_16 = arith.constant 0 : index
      %27 = vector.load %arg6[%c0_15, %c0_16] : memref<1x128xf32, #tpu.memory_space<vmem>>, vector<1x128xf32>
      tpu.vector_store %arg6[%c0_15, %c0_16], %26 {strides = array<i32>} : memref<1x128xf32, #tpu.memory_space<vmem>>, vector<1x128xf32>,
    } else {
    }
    return
  }
  func.func @transform_0(%arg0: i32, %arg1: i32) -> i32 {
    %c0_i32 = arith.constant 0 : i32
    %c0_i32_0 = arith.constant 0 : i32
    return %c0_i32 : i32
  }
  func.func @transform_1(%arg0: i32, %arg1: i32) -> (i32, i32) {
    %c0_i32 = arith.constant 0 : i32
    %c0_i32_0 = arith.constant 0 : i32
    return %c0_i32, %arg0 : i32, i32
  }
  func.func @transform_2(%arg0: i32, %arg1: i32) -> (i32, i32) {
    %c0_i32 = arith.constant 0 : i32
    %c0_i32_0 = arith.constant 0 : i32
    return %c0_i32, %arg1 : i32, i32
  }
  func.func @transform_3(%arg0: i32, %arg1: i32) -> (i32, i32) {
    %c0_i32 = arith.constant 0 : i32
    return %arg1, %arg0 : i32, i32
  }
  func.func @transform_4(%arg0: i32, %arg1: i32) -> (i32, i32) {
    %c0_i32 = arith.constant 0 : i32
    %c0_i32_0 = arith.constant 0 : i32
    return %c0_i32, %arg0 : i32, i32
  }
}

</mosaic_0001>

<bundles_post_ra>
// kernel: tpu_custom_call.1
= control target key start
LH: loop header
LB: loop body
LE: loop exit
PB: predicated region body
PF: predicated region fallthrough
CT: control target
= control target key end

     0   :  { %9 = vsyncpa [#allocation6], 0  ;;  %s395_s0 = inlined_call_operand.hbm [shape: f32[4], index: 0, kind: input, shape index: {}]   ;;  %s396_s1 = inlined_call_operand.vmem [shape: f32[1,128], index: 1, kind: input, shape index: {}]   ;;  %s397_s2 = inlined_call_operand.vmem [shape: f32[1,128], index: 2, kind: input, shape index: {}]   ;;  %s398_s3 = inlined_call_operand.hbm [shape: f32[128,128], index: 3, kind: input, shape index: {}]   ;;  %s399_s4 = inlined_call_operand.hbm [shape: f32[1,128], index: 4, kind: output, shape index: {}]  }
   0x1   :  { %10 = vsyncpa [#allocation4], 0 }
   0x2   :  { %11 = vsyncpa [#allocation5], 0  ;;  %s260_s17 = scalar_lea.hbm %s395_s0, 16 }
   0x3   :  { %p261_p0 = scmp.ne.s32.totalorder %s395_s0, %s260_s17  ;;  %p264_p1 = scmp.lt.u32.totalorder %s260_s17, %s395_s0 }
   0x5   :  { %p266_p2 = pnand %p264_p1, %p261_p0 }
   0x7   :  { %269 = shalt.err (!%p266_p2)
}
   0x8   :  { %s320_s22 = smov [#allocation3]   ;;  %s321_s25 = smov [#allocation7]  }
   0x9   :  { %19 = dma.hbm_to_smem %s395_s0, 16, %s320_s22, [#allocation6]  }
   0xa   :  { %s29_s26 = sshll.u32 %s321_s25, 4  ;;  %s270_s29 = scalar_lea.hbm %s398_s3, 2048  ;;  %s30_s26 = int_to_ptr.vmem [resolvable:$true] %s29_s26 }
   0xb   :  { %p271_p3 = scmp.ne.s32.totalorder %s398_s3, %s270_s29  ;;  %p274_p4 = scmp.lt.u32.totalorder %s270_s29, %s398_s3 }
   0xd   :  { %p276_p5 = pnand %p274_p4, %p271_p3 }
   0xf   :  { %279 = shalt.err (!%p276_p5)
}
  0x10   :  { %s280_s8 = scalar_lea.vmem %s30_s26, 2048  ;;  %p285_p7 = scmp.lt.s32.totalorder %s30_s26, %s30_s26 }
  0x11   :  { %p281_p6 = scmp.ne.s32.totalorder %s30_s26, %s280_s8  ;;  %p286_p8 = scmp.lt.s32.totalorder %s280_s8, %s280_s8 }
  0x13   :  { %p287_p9 = por %p286_p8, %p285_p7 }
  0x15   :  { %p288_p10 = pnand %p287_p9, %p281_p6 }
  0x17   :  { %291 = shalt.err (!%p288_p10)
}
  0x18   :  { %s322_s0 = smov 128   ;;  %s323_s9 = smov 8  }
  0x19   :  { %35 = dma.hbm_to_vmem [thread:$0]  %s398_s3, 2048, %s30_s26, [#allocation4], %s322_s0, %s322_s0, %s323_s9  }
  0x1a   :  { %314 = dma.done.wait [#allocation6], 16  }
  0x1b   :  { %315 = vsyncadd [#allocation6], 4294967280 }
  0x1c   :  { %316 = dma.done.wait [#allocation4], 2048  }
  0x1d   :  { %317 = vsyncadd [#allocation4], 4294965248 }
  0x1e   :  { %42 = sfence }
  0x1f   :  { %v56_v0 = vld [vmem:[#allocation7] sm:$0xff]  ;;  %v57_v1 = vld [vmem:[#allocation7 + $0x8] sm:$0xff]  ;;  %v58_v2 = vld [vmem:[#allocation7 + $0x10] sm:$0xff]  ;;  %v324_v3 = vmov 0.0|0.0   ;;  %v325_v6 = vmov 0.0   ;;  %vm326_vm0 = vmmov 0  }
  0x20   :  { %228 = vmatprep.subr.bf16.mxu0 %v324_v3  ;;  %v229_v4 = vpack.c.bf16 %v57_v1, %v56_v0  ;;  %v59_v5 = vld [vmem:[#allocation7 + $0x18] sm:$0xff]  ;;  %47 = vst [vmem:[#allocation2] sm:$0x1] %v325_v6  ;;  %225 = vmatprep.mubr.msk.f32.mxu0 %vm326_vm0, %v325_v6  ;;  %v60_v8 = vld [vmem:[#allocation7 + $0x20] sm:$0xff]  ;;  %v61_v9 = vld [vmem:[#allocation7 + $0x28] sm:$0xff]  ;;  %s48_s3 = sld [smem:[#allocation3]] }
  0x21   :  { %v232_v7 = vpack.c.bf16 %v59_v5, %v58_v2  ;;  %v235_v10 = vpack.c.bf16 %v61_v9, %v60_v8  ;;  %v62_v11 = vld [vmem:[#allocation7 + $0x30] sm:$0xff]  ;;  %v63_v12 = vld [vmem:[#allocation7 + $0x38] sm:$0xff]  ;;  %v64_v14 = vld [vmem:[#allocation7 + $0x40] sm:$0xff]  ;;  %s173_s12 = sld [smem:[#allocation3 + $0x1]]  ;;  %s174_s15 = sld [smem:[#allocation3 + $0x2]] }
  0x22   :  { %230 = vmatpush3.bf16.msra.mxu0 %v229_v4  ;;  %v238_v13 = vpack.c.bf16 %v63_v12, %v62_v11  ;;  %v65_v15 = vld [vmem:[#allocation7 + $0x48] sm:$0xff]  ;;  %v66_v17 = vld [vmem:[#allocation7 + $0x50] sm:$0xff]  ;;  %v67_v18 = vld [vmem:[#allocation7 + $0x58] sm:$0xff]  ;;  %s175_s16 = sld [smem:[#allocation3 + $0x3]] }
  0x23   :  { %231 = vmatprep.subr.bf16.mxu0 %v324_v3  ;;  %v241_v16 = vpack.c.bf16 %v65_v15, %v64_v14  ;;  %v244_v19 = vpack.c.bf16 %v67_v18, %v66_v17  ;;  %v68_v20 = vld [vmem:[#allocation7 + $0x60] sm:$0xff]  ;;  %v69_v21 = vld [vmem:[#allocation7 + $0x68] sm:$0xff]  ;;  %v49_v23 = vld [vmem:[%s397_s2] sm:$0x1]  ;;  %s327_s2 = smov [#allocation8]  }
  0x24   :  { %v247_v22 = vpack.c.bf16 %v69_v21, %v68_v20  ;;  %v70_v25 = vld [vmem:[#allocation7 + $0x70] sm:$0xff]  ;;  %v71_v26 = vld [vmem:[#allocation7 + $0x78] sm:$0xff]  ;;  %s163_s19 = sshll.u32 %s327_s2, 4  ;;  %s164_s19 = int_to_ptr.vmem [resolvable:$true] %s163_s19 }
  0x25   :  { %v250_v28 = vpack.c.bf16 %v71_v26, %v70_v25  ;;  %v148_v33 = vld [vmem:[%s396_s1] sm:$0x1]  ;;  %s292_s20 = scalar_lea.vmem %s164_s19, 16  ;;  %s296_s21 = scalar_lea.vmem %s164_s19, 32 }
  0x26   :  { %233 = vmatpush3.bf16.msra.mxu0 %v232_v7  ;;  %v50_v24 = vstv %s48_s3  ;;  %p293_p11 = scmp.ne.s32.totalorder %s164_s19, %s292_s20  ;;  %p297_p12 = scmp.lt.s32.totalorder %s164_s19, %s164_s19 }
  0x27   :  { %234 = vmatprep.subr.bf16.mxu0 %v324_v3  ;;  %v51_v27 = vmul.f32 %v50_v24, %v49_v23  ;;  %v53_v29 = vstv %s173_s12  ;;  %v55_v31 = vld [vmem:[#allocation2] sm:$0x1]  ;;  %v149_v34 = vstv %s174_s15  ;;  %p298_p13 = scmp.lt.s32.totalorder %s296_s21, %s292_s20 }
  0x28   :  { %v150_v37 = vmul.f32 %v149_v34, %v148_v33  ;;  %v152_v38 = vstv %s175_s16 }
  0x29   :  { %v54_v30 = vadd.f32 %v53_v29, %v51_v27  ;;  %p299_p0 = por %p298_p13, %p297_p12 }
  0x2a   :  { %236 = vmatpush3.bf16.msra.mxu0 %v235_v10  ;;  %v153_v39 = vadd.f32 %v152_v38, %v150_v37 }
  0x2b   :  { %237 = vmatprep.subr.bf16.mxu0 %v324_v3  ;;  %p300_p1 = pnand %p299_p0, %p293_p11 }
  0x2e   :  { %239 = vmatpush3.bf16.msra.mxu0 %v238_v13 }
  0x2f   :  { %240 = vmatprep.subr.bf16.mxu0 %v324_v3 }
  0x32   :  { %242 = vmatpush3.bf16.msra.mxu0 %v241_v16 }
  0x33   :  { %243 = vmatprep.subr.bf16.mxu0 %v324_v3 }
  0x36   :  { %245 = vmatpush3.bf16.msra.mxu0 %v244_v19 }
  0x37   :  { %246 = vmatprep.subr.bf16.mxu0 %v324_v3 }
  0x3a   :  { %248 = vmatpush3.bf16.msra.mxu0 %v247_v22 }
  0x3b   :  { %249 = vmatprep.subr.bf16.mxu0 %v324_v3 }
  0x3e   :  { %251 = vmatpush3.bf16.msra.mxu0 %v250_v28 }
  0x41   :  { %226 = vmatmul.mubr.f32.vlgmr.msra.gmra.mrb[0].mxu0 %v54_v30 }
 0x114   :  { %v138_v32 = vpop.f32.mrb[0].mxu0 }
 0x115   :  { %v142_v35 = vadd.f32 %v138_v32, %v55_v31  ;;  %v227_v36 = vpop.f32.mrb[1].mxu0 }
 0x117   :  { %143 = vst [vmem:[#allocation2] sm:$0x1] %v142_v35 }
 0x11e   :  { %v154_v40 = vld [vmem:[#allocation2] sm:$0x1] }
 0x11f   :  { %v155_v41 = vadd.f32 %v154_v40, %v153_v39 }
 0x121   :  { %156 = vst [vmem:[#allocation8] sm:$0x1] %v155_v41 }
 0x122   :  { %303 = shalt.err (!%p300_p1)
}
 0x123   :  { %s304_s23 = scalar_lea.hbm %s399_s4, 16 }
 0x124   :  { %p305_p2 = scmp.ne.s32.totalorder %s399_s4, %s304_s23  ;;  %p308_p3 = scmp.lt.u32.totalorder %s304_s23, %s399_s4 }
 0x126   :  { %p310_p4 = pnand %p308_p3, %p305_p2 }
 0x128   :  { %313 = shalt.err (!%p310_p4)
}
 0x129   :  { %166 = dma.vmem_to_hbm [thread:$0]  %s164_s19, 16, %s399_s4, [#allocation5]  }
 0x12a   :  { %318 = dma.done.wait [#allocation5], 16  }
 0x12b   :  { %319 = vsyncadd [#allocation5], 4294967280 }
 0x12c   :  { %170 = vsyncpa [#allocation4], 1 }
 0x12d   :  { %171 = vsyncpa [#allocation5], 1 }
 0x12e   :  { %172 = vsyncpa [#allocation6], 1 }

</bundles_post_ra>
